<compile_context>
chip_gen: v5e
topology: v5e:2x2
jax: 0.10.0
libtpu: 0.0.40
codegen_flags: <defaults>
</compile_context>

<pallas_src>
import functools

import jax
import jax.numpy as jnp
from jax.experimental import pallas as pl
from jax.experimental.pallas import tpu as pltpu

_COS_EPS = 1e-8                      # torch.cosine_similarity default eps
_EPS2 = _COS_EPS * _COS_EPS
_LANES = 128
_SUBLANES = 8


def _normal_sim_loss_kernel(pred_ref, tgt_ref, mask_ref, out_ref, *, p_rows):
    # pred_ref : (1, 3, TM, 128)
    # tgt_ref  : (1, 4, TM, 128)  ch 0..2 = gt normal (zero border), ch 3 = certainty
    # mask_ref : (1, 1, TM, 128)
    # out_ref  : (1, 1, 8, 128)   per-tile lane-dense partial sums
    _, _, tm, ln = pred_ref.shape
    pred = pred_ref[...].reshape(3, tm, ln).astype(jnp.float32)
    tgt = tgt_ref[...].reshape(4, tm, ln).astype(jnp.float32)
    gt = tgt[0:3]
    cert = tgt[3]
    m = mask_ref[...].reshape(tm, ln).astype(jnp.float32)

    # cosine similarity along the channel axis (torch semantics)
    num = jnp.sum(pred * gt, axis=0)                    # (TM, 128)  3 VPU FMAs
    pn2 = jnp.sum(pred * pred, axis=0)
    gn2 = jnp.sum(gt * gt, axis=0)
    cos = num * jax.lax.rsqrt(jnp.maximum(pn2 * gn2, _EPS2))

    # clamp to [-1, 1], negate (compute_normal_error), mask & certainty weight
    loss = m * cert * (-jnp.clip(cos, -1.0, 1.0))       # (TM, 128)

    # Ragged last tile: rows >= p_rows - p*TM are Pallas block padding with
    # unspecified contents -- select (not multiply) so garbage/NaN is discarded.
    rows_left = p_rows - pl.program_id(0) * tm
    row_id = jax.lax.broadcasted_iota(jnp.int32, (tm, ln), 0)
    loss = jnp.where(row_id < rows_left, loss, 0.0)

    # Reduce only over the sublane-group axis (pure VPU adds, no XLU, no
    # lane-sparse store); wrapper does the final cross-lane sum of (8,128).
    partial = jnp.sum(loss.reshape(tm // _SUBLANES, _SUBLANES, ln), axis=0)
    out_ref[...] = partial.reshape(1, 1, _SUBLANES, ln)


def prepare_normal_targets(normal_map, certainty_map):
    """One-time 'module init' work: fold the [:, :, 4:-4, 4:-4] crop into the
    targets by zero-padding them back to full resolution (border pixels then
    contribute exactly 0: gt=0 -> cos=0, cert=0), and pack the certainty map
    as a 4th channel so the kernel streams one target tensor instead of two."""
    gt_full = jnp.pad(normal_map, ((0, 0), (0, 0), (4, 4), (4, 4)))
    cert_full = jnp.pad(certainty_map, ((0, 0), (0, 0), (4, 4), (4, 4)))
    return jnp.concatenate([gt_full, cert_full], axis=1)      # (1, 4, H, W)


def _to_lane_tiles(x, p, p_pad):
    b, c = x.shape[0], x.shape[1]
    xf = x.reshape(b, c, p)               # contiguous-dim merge: free reshape
    if p_pad != p:
        # Only when H*W is not already lane-aligned (typical camera
        # resolutions are); padded pixels contribute exactly 0.
        xf = jnp.pad(xf, ((0, 0), (0, 0), (0, p_pad - p)))
    return xf.reshape(b, c, p_pad // _LANES, _LANES)


def normal_similarity_loss(pred_norm, mask, target_full, *, tm_cap=1024):
    """
    pred_norm   : (B, 3, H, W)  f32 or bf16
    mask        : (B, 1, H, W)  f32 or bf16 (0/1)
    target_full : (1, 4, H, W)  from prepare_normal_targets
    tm_cap      : pixel rows (of 128 lanes) per grid step.  1024 -> ~4 MiB of
                  f32 inputs per step (~8 MiB double-buffered), inside every
                  generation's default scoped-VMEM limit; bump to 2048 on v7x.
    Returns the scalar mean loss == torch.mean over (B, 1, H-8, W-8).
    """
    # TODO(synk): the module's isnan/isinf early-exit checks are host-side
    # control flow (print + exit) and are not translated.
    B, C, H, W = pred_norm.shape
    assert C == 3 and target_full.shape == (1, 4, H, W) and mask.shape == (B, 1, H, W)
    Hc, Wc = H - 8, W - 8

    # Sub-32-bit dtypes pack along sublanes -> keep tile rows a multiple of
    # the packing quantum (8 for f32, 16 for bf16, 32 for int8).
    min_itemsize = int(min(jnp.dtype(a.dtype).itemsize
                           for a in (pred_norm, mask, target_full)))
    quantum = max(_SUBLANES, 32 // min_itemsize)

    P = H * W
    P_pad = max(((P + _LANES - 1) // _LANES) * _LANES, quantum * _LANES)
    p_rows = P_pad // _LANES

    pred4 = _to_lane_tiles(pred_norm, P, P_pad)      # (B, 3, p_rows, 128)
    tgt4 = _to_lane_tiles(target_full, P, P_pad)     # (1, 4, p_rows, 128)
    mask4 = _to_lane_tiles(mask, P, P_pad)           # (B, 1, p_rows, 128)

    # Largest quantum-multiple tile <= min(tm_cap, p_rows); the ragged last
    # tile (grid = cdiv) is masked in-kernel, so tm never collapses on
    # non-power-of-two pixel counts (no power-of-two-divisor search).
    tm = max(quantum, (min(tm_cap, p_rows) // quantum) * quantum)
    np_tiles = pl.cdiv(p_rows, tm)

    out_bytes = B * np_tiles * _SUBLANES * _LANES * 4
    cost = pl.CostEstimate(
        flops=23 * B * P_pad,
        transcendentals=B * P_pad,
        bytes_accessed=(3 * B * P_pad * jnp.dtype(pred_norm.dtype).itemsize
                        + B * P_pad * jnp.dtype(mask.dtype).itemsize
                        + 4 * P_pad * jnp.dtype(target_full.dtype).itemsize
                        + out_bytes),
    )

    kernel = functools.partial(_normal_sim_loss_kernel, p_rows=p_rows)
    partials = pl.pallas_call(
        kernel,
        out_shape=jax.ShapeDtypeStruct((B, np_tiles, _SUBLANES, _LANES), jnp.float32),
        grid_spec=pltpu.PrefetchScalarGridSpec(
            num_scalar_prefetch=0,
            # B innermost so the broadcast target tile stays VMEM-resident
            # across batches (DMA'd once per pixel tile, not once per (tile, b)).
            grid=(np_tiles, B),
            in_specs=[
                pl.BlockSpec((1, 3, tm, _LANES), lambda p, b: (b, 0, p, 0)),   # pred
                pl.BlockSpec((1, 4, tm, _LANES), lambda p, b: (0, 0, p, 0)),   # gt+cert (broadcast)
                pl.BlockSpec((1, 1, tm, _LANES), lambda p, b: (b, 0, p, 0)),   # mask
            ],
            out_specs=pl.BlockSpec((1, 1, _SUBLANES, _LANES), lambda p, b: (b, p, 0, 0)),
        ),
        compiler_params=pltpu.CompilerParams(
            # No cross-step carry.  Only the pixel-tile axis may be sharded
            # across TensorCores (v7x megacore); B stays "arbitrary" so the
            # broadcast-target DMA reuse is never split across cores.
            dimension_semantics=("parallel", "arbitrary"),
        ),
        cost_estimate=cost,
    )(pred4, tgt4, mask4)

    # torch.mean over the (B, 1, Hc, Wc) cropped loss tensor
    return jnp.sum(partials) / jnp.float32(B * Hc * Wc)


if __name__ == "__main__":
    key = jax.random.PRNGKey(0)

    def ref_loss(pred_norm, mask, normal_map, certainty_map):
        p = pred_norm[:, :, 4:-4, 4:-4]
        num = jnp.sum(p * normal_map, axis=1, keepdims=True)
        den = jnp.maximum(
            jnp.linalg.norm(p, axis=1, keepdims=True)
            * jnp.linalg.norm(normal_map, axis=1, keepdims=True),
            _COS_EPS)
        err = -jnp.clip(num / den, -1.0, 1.0)
        return jnp.mean(mask[:, :, 4:-4, 4:-4] * certainty_map * err)

    # ---- case 1: B=2, 32x32 (lane-aligned pixel count, single full tile) ----
    k1, k2, k3, k4, key = jax.random.split(key, 5)
    B, H, W = 2, 32, 32
    Hc, Wc = H - 8, W - 8
    normal_map = 2.0 * jax.random.uniform(k1, (1, 3, Hc, Wc), dtype=jnp.float32) - 1.0
    certainty_map = jax.random.uniform(k2, (1, 1, Hc, Wc), dtype=jnp.float32)
    pred_norm = jax.random.normal(k3, (B, 3, H, W), dtype=jnp.float32)
    mask = (jax.random.uniform(k4, (B, 1, H, W)) > 0.5).astype(jnp.float32)

    target_full = prepare_normal_targets(normal_map, certainty_map)   # module init
    loss = normal_similarity_loss(pred_norm, mask, target_full)
    jax.block_until_ready(loss)
    want = ref_loss(pred_norm, mask, normal_map, certainty_map)
    assert jnp.allclose(loss, want, atol=1e-5, rtol=1e-5), (loss, want)

    # bf16 inputs (kernel upcasts internally; halves HBM traffic)
    loss_bf16 = normal_similarity_loss(
        pred_norm.astype(jnp.bfloat16), mask.astype(jnp.bfloat16),
        target_full.astype(jnp.bfloat16))
    jax.block_until_ready(loss_bf16)
    assert jnp.allclose(loss_bf16, want, atol=1e-2), (loss_bf16, want)

    # ---- case 2: ragged pixel count (P % 1024 != 0) + multiple pixel tiles ----
    k1, k2, k3, k4, key = jax.random.split(key, 5)
    B2, H2, W2 = 1, 36, 40
    Hc2, Wc2 = H2 - 8, W2 - 8
    normal_map2 = 2.0 * jax.random.uniform(k1, (1, 3, Hc2, Wc2), dtype=jnp.float32) - 1.0
    certainty_map2 = jax.random.uniform(k2, (1, 1, Hc2, Wc2), dtype=jnp.float32)
    pred_norm2 = jax.random.normal(k3, (B2, 3, H2, W2), dtype=jnp.float32)
    mask2 = (jax.random.uniform(k4, (B2, 1, H2, W2)) > 0.5).astype(jnp.float32)

    target_full2 = prepare_normal_targets(normal_map2, certainty_map2)
    loss2 = normal_similarity_loss(pred_norm2, mask2, target_full2, tm_cap=8)
    jax.block_until_ready(loss2)
    want2 = ref_loss(pred_norm2, mask2, normal_map2, certainty_map2)
    assert jnp.allclose(loss2, want2, atol=1e-5, rtol=1e-5), (loss2, want2)

    print("KERNEL_OK")
</pallas_src>

<mosaic_0001>
module attributes {stable_mosaic.version = 11 : i64} {
  func.func @_normal_sim_loss_kernel(%arg0: i32, %arg1: i32, %arg2: memref<1x3x8x128xf32, #tpu.memory_space<vmem>>, %arg3: memref<1x4x8x128xf32, #tpu.memory_space<vmem>>, %arg4: memref<1x1x8x128xf32, #tpu.memory_space<vmem>>, %arg5: memref<1x1x8x128xf32, #tpu.memory_space<vmem>>) attributes {dimension_semantics = [#tpu.dimension_semantics<parallel>, #tpu.dimension_semantics<arbitrary>], iteration_bounds = array<i64: 1, 2>, scalar_prefetch = 0 : i64, scratch_operands = 0 : i64, tpu.core_type = #tpu.core_type<tc>, window_params = [{transform_indices = @transform_0, window_bounds = array<i64: 1, 3, 8, 128>}, {transform_indices = @transform_1, window_bounds = array<i64: 1, 4, 8, 128>}, {transform_indices = @transform_2, window_bounds = array<i64: 1, 1, 8, 128>}, {transform_indices = @transform_3, window_bounds = array<i64: 1, 1, 8, 128>}]} {
    %c0 = arith.constant 0 : index
    %c0_0 = arith.constant 0 : index
    %c0_1 = arith.constant 0 : index
    %c0_2 = arith.constant 0 : index
    %0 = vector.load %arg2[%c0, %c0_0, %c0_1, %c0_2] : memref<1x3x8x128xf32, #tpu.memory_space<vmem>>, vector<1x3x8x128xf32>
    %1 = vector.shape_cast %0 : vector<1x3x8x128xf32> to vector<3x8x128xf32>
    %c0_3 = arith.constant 0 : index
    %c0_4 = arith.constant 0 : index
    %c0_5 = arith.constant 0 : index
    %c0_6 = arith.constant 0 : index
    %2 = vector.load %arg3[%c0_3, %c0_4, %c0_5, %c0_6] : memref<1x4x8x128xf32, #tpu.memory_space<vmem>>, vector<1x4x8x128xf32>
    %3 = vector.shape_cast %2 : vector<1x4x8x128xf32> to vector<4x8x128xf32>
    %4 = vector.extract_strided_slice %3 {offsets = [0, 0, 0], sizes = [3, 8, 128], strides = [1, 1, 1]} : vector<4x8x128xf32> to vector<3x8x128xf32>
    %5 = vector.extract_strided_slice %3 {offsets = [3, 0, 0], sizes = [1, 8, 128], strides = [1, 1, 1]} : vector<4x8x128xf32> to vector<1x8x128xf32>
    %6 = vector.shape_cast %5 : vector<1x8x128xf32> to vector<8x128xf32>
    %c0_7 = arith.constant 0 : index
    %c0_8 = arith.constant 0 : index
    %c0_9 = arith.constant 0 : index
    %c0_10 = arith.constant 0 : index
    %7 = vector.load %arg4[%c0_7, %c0_8, %c0_9, %c0_10] : memref<1x1x8x128xf32, #tpu.memory_space<vmem>>, vector<1x1x8x128xf32>
    %8 = vector.shape_cast %7 : vector<1x1x8x128xf32> to vector<8x128xf32>
    %9 = arith.mulf %1, %4 : vector<3x8x128xf32>
    %cst = arith.constant dense<0.000000e+00> : vector<8x128xf32>
    %10 = vector.multi_reduction <add>, %9, %cst [0] : vector<3x8x128xf32> to vector<8x128xf32>
    %11 = arith.mulf %1, %1 : vector<3x8x128xf32>
    %cst_11 = arith.constant dense<0.000000e+00> : vector<8x128xf32>
    %12 = vector.multi_reduction <add>, %11, %cst_11 [0] : vector<3x8x128xf32> to vector<8x128xf32>
    %13 = arith.mulf %4, %4 : vector<3x8x128xf32>
    %cst_12 = arith.constant dense<0.000000e+00> : vector<8x128xf32>
    %14 = vector.multi_reduction <add>, %13, %cst_12 [0] : vector<3x8x128xf32> to vector<8x128xf32>
    %15 = arith.mulf %12, %14 : vector<8x128xf32>
    %cst_13 = arith.constant 1.000000e-16 : f32
    %16 = vector.broadcast %cst_13 : f32 to vector<8x128xf32>
    %17 = arith.maximumf %15, %16 : vector<8x128xf32>
    %18 = math.rsqrt %17 : vector<8x128xf32>
    %19 = arith.mulf %10, %18 : vector<8x128xf32>
    %20 = arith.mulf %8, %6 : vector<8x128xf32>
    %cst_14 = arith.constant -1.000000e+00 : f32
    %cst_15 = arith.constant 1.000000e+00 : f32
    %21 = vector.broadcast %cst_14 : f32 to vector<8x128xf32>
    %22 = arith.maximumf %21, %19 : vector<8x128xf32>
    %23 = vector.broadcast %cst_15 : f32 to vector<8x128xf32>
    %24 = arith.minimumf %23, %22 : vector<8x128xf32>
    %cst_16 = arith.constant 0.000000e+00 : f32
    %25 = vector.broadcast %cst_16 : f32 to vector<8x128xf32>
    %26 = arith.subf %25, %24 : vector<8x128xf32>
    %27 = arith.mulf %20, %26 : vector<8x128xf32>
    %c8_i32 = arith.constant 8 : i32
    %28 = arith.muli %arg0, %c8_i32 : i32
    %c8_i32_17 = arith.constant 8 : i32
    %29 = arith.subi %c8_i32_17, %28 : i32
    %30 = tpu.iota {dimensions = array<i32: 0>} : vector<8x128xi32>
    %31 = vector.broadcast %29 : i32 to vector<8x128xi32>
    %32 = arith.cmpi slt, %30, %31 : vector<8x128xi32>
    %cst_18 = arith.constant 0.000000e+00 : f32
    %33 = vector.broadcast %cst_18 : f32 to vector<8x128xf32>
    %34 = arith.select %32, %27, %33 : vector<8x128xi1>, vector<8x128xf32>
    %35 = vector.shape_cast %34 : vector<8x128xf32> to vector<1x8x128xf32>
    %cst_19 = arith.constant dense<0.000000e+00> : vector<8x128xf32>
    %36 = vector.multi_reduction <add>, %35, %cst_19 [0] : vector<1x8x128xf32> to vector<8x128xf32>
    %37 = vector.shape_cast %36 : vector<8x128xf32> to vector<1x1x8x128xf32>
    %c0_20 = arith.constant 0 : index
    %c0_21 = arith.constant 0 : index
    %c0_22 = arith.constant 0 : index
    %c0_23 = arith.constant 0 : index
    %38 = vector.load %arg5[%c0_20, %c0_21, %c0_22, %c0_23] : memref<1x1x8x128xf32, #tpu.memory_space<vmem>>, vector<1x1x8x128xf32>
    tpu.vector_store %arg5[%c0_20, %c0_21, %c0_22, %c0_23], %37 {strides = array<i32>} : memref<1x1x8x128xf32, #tpu.memory_space<vmem>>, vector<1x1x8x128xf32>,
    return
  }
  func.func @transform_0(%arg0: i32, %arg1: i32) -> (i32, i32, i32, i32) {
    %c0_i32 = arith.constant 0 : i32
    %c0_i32_0 = arith.constant 0 : i32
    %c0_i32_1 = arith.constant 0 : i32
    return %arg1, %c0_i32, %arg0, %c0_i32_0 : i32, i32, i32, i32
  }
  func.func @transform_1(%arg0: i32, %arg1: i32) -> (i32, i32, i32, i32) {
    %c0_i32 = arith.constant 0 : i32
    %c0_i32_0 = arith.constant 0 : i32
    %c0_i32_1 = arith.constant 0 : i32
    %c0_i32_2 = arith.constant 0 : i32
    return %c0_i32, %c0_i32_0, %arg0, %c0_i32_1 : i32, i32, i32, i32
  }
  func.func @transform_2(%arg0: i32, %arg1: i32) -> (i32, i32, i32, i32) {
    %c0_i32 = arith.constant 0 : i32
    %c0_i32_0 = arith.constant 0 : i32
    %c0_i32_1 = arith.constant 0 : i32
    return %arg1, %c0_i32, %arg0, %c0_i32_0 : i32, i32, i32, i32
  }
  func.func @transform_3(%arg0: i32, %arg1: i32) -> (i32, i32, i32, i32) {
    %c0_i32 = arith.constant 0 : i32
    %c0_i32_0 = arith.constant 0 : i32
    %c0_i32_1 = arith.constant 0 : i32
    return %arg1, %arg0, %c0_i32, %c0_i32_0 : i32, i32, i32, i32
  }
}

</mosaic_0001>

<bundles_post_ra>
// kernel: tpu_custom_call.1
= control target key start
LH: loop header
LB: loop body
LE: loop exit
PB: predicated region body
PF: predicated region fallthrough
CT: control target
= control target key end

     0   :  { %s937_s0 = inlined_call_operand.hbm [shape: f32[2,3,8,128], index: 0, kind: input, shape index: {}]   ;;  %s938_s1 = inlined_call_operand.hbm [shape: f32[1,4,8,128], index: 1, kind: input, shape index: {}]   ;;  %s939_s2 = inlined_call_operand.hbm [shape: f32[2,1,8,128], index: 2, kind: input, shape index: {}]   ;;  %s940_s3 = inlined_call_operand.hbm [shape: f32[2,1,8,128], index: 3, kind: output, shape index: {}]  }
   0x1   :  { %943 = sst [smem:[#allocation13_spill]] %s937_s0 }
   0x2   :  { %944 = sst [smem:[#allocation14_spill]] %s938_s1 }
   0x3   :  { %8 = vsyncpa [#allocation3], 0 }
   0x4   :  { %10 = vsyncpa [#allocation3 + $0x1], 0 }
   0x5   :  { %11 = vsyncpa [#allocation6], 0 }
   0x6   :  { %12 = vsyncpa [#allocation4], 0 }
   0x7   :  { %14 = vsyncpa [#allocation4 + $0x1], 0  ;;  %s759_s12 = smov 0   ;;  %s761_s13 = smov 0  }
   0x8   :  { %s763_s14 = smov 0   ;;  %s765_s15 = smov 0  }
   0x9   :  { %s767_s16 = smov 0   ;;  %s769_s17 = smov 0  }
   0xa LB: > { %s29_s18 = sadd.s32 1, %s730_s16  ;;  %s41_s19 = sadd.s32 1, %s722_s14  ;;  %s734_s17 = sphi %s769_s17, %s20_s17   ;;  %s730_s16 = sphi %s767_s16, %s958_s16   ;;  %s726_s15 = sphi %s765_s15, %s957_s15   ;;  %s722_s14 = sphi %s763_s14, %s956_s14   ;;  %s718_s13 = sphi %s761_s13, %s955_s13   ;;  %s714_s12 = sphi %s759_s12, %s954_s12  }
   0xb   : > { %p30_p0 = scmp.ge.s32.totalorder %s29_s18, 2  ;;  %p48_p1 = scmp.ne.s32.totalorder %s722_s14, %s718_s13 }
   0xc   : > { %p49_p2 = scmp.eq.s32.totalorder %s734_s17, 0  ;;  %p456_p4 = scmp.ge.s32.totalorder %s734_s17, 2 }
   0xd   : > { %s960_s18 = smov (%p30_p0, %s29_s18), 0  ;;  %p498_p6 = scmp.lt.s32.totalorder %s734_s17, 2 }
   0xe   : > { %p50_p3 = por %p49_p2, %p48_p1  ;;  %s36_s20 = ssub.s32 %s730_s16, %s960_s18 }
   0xf   : > { %p39_p5 = scmp.eq.s32.totalorder %s36_s20, 0  ;;  %s176_s21 = sand.u32 1, %s734_s17  }
  0x10   : > { %s178_s22 = sand.u32 1, %s722_s14   ;;  %s470_s25 = smul.u32 24, %s730_s16 }
  0x11   : > { %s806_s23 = scalar_select %p39_p5, %s722_s14, %s41_s19  }
  0x12   : > { %s469_s24 = smul.u32 24, %s178_s22  ;;  %p809_p7 = pnand %p498_p6, %p50_p3 }
  0x13   : > { %s946_s0 = sld [smem:[#allocation13_spill]]  ;;  %s816_s6 = scalar_lea.sflag [#allocation3], %s176_s21 }
  0x14   : > { %s180_s30 = scalar_lea.vmem [#allocation2], %s469_s24  ;;  %s941_s7 = smov 128  }
  0x15   : > { %s189_s4 = sshll.u32 %s180_s30, 4  ;;  %s942_s8 = smov 8   ;;  %s190_s4 = int_to_ptr.vmem [resolvable:$true] %s189_s4 }
  0x16   : > { %s825_s9 = sadd.s32 4294967295, %s734_s17   ;;  %s453_s10 = sadd.s32 4294967294, %s734_s17  }
  0x17   : > { %p54_p8 = scmp.ne.s32.totalorder %s718_s13, %s714_s12  ;;  %p55_p9 = scmp.eq.s32.totalorder %s825_s9, 0 }
  0x18   : > { %p134_p10 = scmp.eq.s32.totalorder %s825_s9, 1  ;;  %p140_p11 = scmp.eq.s32.totalorder %s453_s10, 1 }
  0x19   : > { %s186_s29 = scalar_lea.hbm %s946_s0, %s470_s25  ;;  %p454_p12 = scmp.ge.s32.totalorder %s734_s17, 1 }
  0x1a   : > { %s187_s5 = sshll.u32 %s186_s29, 4  ;;  %p835_p13 = por %p55_p9, %p54_p8  ;;  %s188_s5 = int_to_ptr.hbm [resolvable:$true] %s187_s5 }
  0x1b   : > { %489 = dma.hbm_to_vmem [thread:$0]  (!%p809_p7), %s188_s5, 384, %s190_s4, %s816_s6, %s941_s7, %s941_s7, %s942_s8  }
  0x1c   : > { %p842_p0 = por %p134_p10, %p48_p1  ;;  %p846_p2 = por %p140_p11, %p54_p8 }
  0x1d   : > { %p147_p3 = scmp.lt.s32.totalorder %s734_s17, 3  ;;  %s950_s1 = sld [smem:[#allocation14_spill]] }
  0x1e   : > { %s458_s28 = sshll.u32 %s178_s22, 3  ;;  %s738_s29 = smov [#allocation5]  }
  0x1f   : > { %p854_p5 = pnand %p454_p12, %p147_p3  ;;  %s162_s30 = sshll.u32 %s738_s29, 4  ;;  %s163_s30 = int_to_ptr.vmem [resolvable:$true] %s162_s30 }
  0x20   : > { %s459_s4 = sshll.u32 %s730_s16, 3  ;;  %s203_s24 = scalar_lea.vmem [#allocation7], %s458_s28 }
  0x21   : > { %p482_p1 = pneg %p854_p5  ;;  %s208_s21 = scalar_lea.hbm %s939_s2, %s459_s4 }
  0x22   : > { %s212_s7 = sshll.u32 %s203_s24, 4  ;;  %s210_s8 = sshll.u32 %s208_s21, 4  ;;  %s211_s8 = int_to_ptr.hbm [resolvable:$true] %s210_s8  ;;  %s213_s7 = int_to_ptr.vmem [resolvable:$true] %s212_s7 }
  0x23   : > { %s160_s25 = sshll.u32 %s950_s1, 4  ;;  %p483_p6 = pnand %p482_p1, %p55_p9  ;;  %s161_s25 = int_to_ptr.hbm [resolvable:$true] %s160_s25 }
  0x24   : > { %s952_s0 = smov 8   ;;  %s953_s1 = smov 128  }
  0x25   : > { %485 = dma.hbm_to_vmem [thread:$0]  (!%p483_p6), %s161_s25, 512, %s163_s30, [#allocation6], %s953_s1, %s953_s1, %s952_s0  }
  0x26   : > { %492 = dma.hbm_to_vmem [thread:$0]  (!%p809_p7), %s211_s8, 128, %s213_s7, %s816_s6  }
  0x27   : > { %221 = sbr.rel (%p854_p5) target bundleno = 92 (0x5c), region = 32  ;;  %s223_s22 = sand.u32 (!%p854_p5), 1, %s825_s9  }
  0x28   : > { %s876_s29 = sand.u32 (!%p854_p5), 1, %s718_s13   ;;  %s224_s4 = scalar_lea.sflag (!%p854_p5), [#allocation3], %s223_s22 }
  0x29   : > { %s471_s28 = smul.u32 (!%p854_p5), 24, %s876_s29 }
  0x2b   : > { %s227_s5 = scalar_lea.vmem (!%p854_p5), [#allocation2], %s471_s28 }
  0x2c   : > { %697 = dma.done.wait (%p835_p13), %s224_s4, 384  }
  0x2d   : > { %699 = vsyncadd (%p835_p13), %s224_s4, 4294966912 }
  0x2e   : > { %701 = dma.done.wait (%p55_p9), [#allocation6], 512  }
  0x2f   : > { %703 = vsyncadd (%p55_p9), [#allocation6], 4294966784  ;;  %s462_s0 = sshll.u32 %s876_s29, 3 }
  0x30   : > { %s890_s1 = scalar_lea.vmem [#allocation7], %s462_s0 }
  0x31   : > { %705 = dma.done.wait (%p835_p13), %s224_s4, 128  }
  0x32   : > { %707 = vsyncadd (%p835_p13), %s224_s4, 4294967168  ;;  %v271_v0 = vld [vmem:[%s227_s5] sm:$0xff]  ;;  %v272_v1 = vld [vmem:[%s227_s5 + $0x8] sm:$0xff]  ;;  %s466_s26 = sshll.u32 %s726_s15, 3  ;;  %s270_s9 = scalar_lea.vmem [#allocation8], %s462_s0 }
  0x33   : > { %v273_v2 = vld [vmem:[%s227_s5 + $0x10] sm:$0xff]  ;;  %v275_v4 = vld [vmem:[#allocation5 + $0x8] sm:$0xff]  ;;  %v276_v5 = vld [vmem:[#allocation5 + $0x10] sm:$0xff]  ;;  %v284_v6 = vmul.f32 %v271_v0, %v271_v0  ;;  %v285_v7 = vmul.f32 %v272_v1, %v272_v1  ;;  %s333_s8 = scalar_lea.hbm %s940_s3, %s466_s26  ;;  %s335_s11 = sshll.u32 %s270_s9, 4  ;;  %s336_s11 = int_to_ptr.vmem [resolvable:$true] %s335_s11 }
  0x34   : > { %v274_v3 = vld [vmem:[#allocation5] sm:$0xff]  ;;  %v286_v8 = vmul.f32 %v273_v2, %v273_v2  ;;  %v290_v11 = vmul.f32 %v275_v4, %v275_v4  ;;  %v291_v12 = vmul.f32 %v276_v5, %v276_v5  ;;  %v280_v20 = vmul.f32 %v275_v4, %v272_v1  ;;  %v277_v29 = vld [vmem:[#allocation5 + $0x18] sm:$0xff]  ;;  %s337_s25 = sshll.u32 %s333_s8, 4  ;;  %s322_s15 = scalar_lea.sflag [#allocation4], %s876_s29  ;;  %s338_s25 = int_to_ptr.hbm [resolvable:$true] %s337_s25 }
  0x35   : > { %v289_v9 = vmul.f32 %v274_v3, %v274_v3  ;;  %v287_v10 = vadd.f32 %v285_v7, %v284_v6  ;;  %v279_v19 = vmul.f32 %v274_v3, %v271_v0  ;;  %v281_v23 = vmul.f32 %v276_v5, %v273_v2  ;;  %v278_v30 = vld [vmem:[%s890_s1] sm:$0xff]  ;;  %s658_s27 = sshra.s32 %s338_s25, 4  ;;  %s664_s24 = scalar_lea.hbm %s940_s3, 16  ;;  %s659_s27 = int_to_ptr.hbm [resolvable:$true] %s658_s27 }
  0x36   : > { %v307_v33 = vmul.f32 %v278_v30, %v277_v29  ;;  %s660_s30 = scalar_lea.hbm %s659_s27, 8  ;;  %p665_p10 = scmp.lt.s32.totalorder %s659_s27, %s940_s3 }
  0x37   : > { %v288_v13 = vadd.f32 %v287_v10, %v286_v8  ;;  %v292_v14 = vadd.f32 %v290_v11, %v289_v9  ;;  %v282_v24 = vadd.f32 %v280_v20, %v279_v19  ;;  %p661_p7 = scmp.ne.s32.totalorder %s659_s27, %s660_s30  ;;  %p666_p11 = scmp.lt.s32.totalorder %s664_s24, %s660_s30 }
  0x39   : > { %v293_v15 = vadd.f32 %v292_v14, %v291_v12  ;;  %v283_v27 = vadd.f32 %v282_v24, %v281_v23  ;;  %p662_p8 = pnand %p661_p7, %p842_p0  ;;  %p667_p12 = por %p666_p11, %p665_p10 }
  0x3b   : > { %v294_v16 = vmul.f32 %v293_v15, %v288_v13  ;;  %p663_p9 = pneg %p662_p8 }
  0x3d   : > { %v295_v17 = vmax.f32 %v294_v16, 1e-16  ;;  %p668_p13 = pnand %p667_p12, %p663_p9 }
  0x3f   : > { %552 = vrsqrt.f32 %v295_v17  ;;  %vm302_vm0 = vweird.f32 %v295_v17 }
  0x45   : > { %v553_v18 = vpop.eup %552 }
  0x46   : > { %v297_v21 = vmul.f32 %v553_v18, %v295_v17  ;;  %vm303_vm1 = vweird.f32 %v553_v18 }
  0x47   : > { %vm304_vm2 = vmor %vm302_vm0, %vm303_vm1 }
  0x48   : > { %v298_v22 = vmul.f32 %v553_v18, %v297_v21 }
  0x4a   : > { %v299_v25 = vmul.f32 0.5, %v298_v22 }
  0x4c   : > { %v300_v26 = vsub.f32 1.5, %v299_v25 }
  0x4e   : > { %v301_v28 = vmul.f32 %v553_v18, %v300_v26 }
  0x50   : > { %v305_v31 = vsel %vm304_vm2, %v553_v18, %v301_v28 }
  0x51   : > { %v306_v32 = vmul.f32 %v305_v31, %v283_v27 }
  0x53   : > { %v464_v34 = vclamps-f32 %v306_v32, 1.0 }
  0x55   : > { %v310_v35 = vsub.f32 0.0, %v464_v34 }
  0x57   : > { %v311_v36 = vmul.f32 %v310_v35, %v307_v33 }
  0x59   : > { %320 = vst [vmem:[%s270_s9] sm:$0xff] %v311_v36 }
  0x5a   : > { %671 = shalt.err (!%p668_p13)
}
  0x5b   : > { %480 = dma.vmem_to_hbm [thread:$0]  (%p842_p0), %s336_s11, 128, %s338_s25, %s322_s15  }
  0x5c PF: > { %s349_s29 = sand.u32 1, %s714_s12   ;;  %p494_p3 = pnand %p456_p4, %p846_p2 }
  0x5d   : > { %s350_s4 = scalar_lea.sflag [#allocation4], %s349_s29 }
  0x5e   : > { %p495_p5 = pneg %p494_p3 }
  0x60   : > { %709 = dma.done.wait (%p495_p5), %s350_s4, 128  }
  0x61   : > { %711 = vsyncadd (%p495_p5), %s350_s4, 4294967168  ;;  %s20_s17 = sadd.s32 1, %s734_s17   ;;  %s954_s12 = smov %s718_s13 }
  0x62   : > { %p17_p1 = scmp.ge.s32.totalorder %s20_s17, 4   ;;  %s955_s13 = smov %s722_s14 }
  0x63   : > { %s956_s14 = smov %s806_s23  ;;  %s957_s15 = smov %s730_s16 }
  0x64   : > { %s958_s16 = smov %s960_s18  ;;  %19 = sbr.rel (!%p17_p1) target bundleno = 10 (0xa), region = 93 }
  0x69   :  { %356 = vsyncpa [#allocation3], 1 }
  0x6a   :  { %358 = vsyncpa [#allocation3 + $0x1], 1 }
  0x6b   :  { %359 = vsyncpa [#allocation6], 1 }
  0x6c   :  { %360 = vsyncpa [#allocation4], 1 }
  0x6d   :  { %362 = vsyncpa [#allocation4 + $0x1], 1 }

</bundles_post_ra>
